<compile_context>
chip_gen: v5e
topology: v5e:2x2
jax: 0.10.0
libtpu: 0.0.40
codegen_flags: <defaults>
</compile_context>

<pallas_src>
import functools

import jax
import jax.numpy as jnp
from jax import lax
from jax.experimental import pallas as pl
from jax.experimental.pallas import tpu as pltpu


# ---------------------------------------------------------------------------
# Kernel body: processes a (block_b, N, D) slab of F per grid step.
# ---------------------------------------------------------------------------
def _sam3e_compute(f_ref, k_ref, q_ref, o_ref):
    tb, n, d = f_ref.shape
    f = f_ref[...]                                   # (TB, N, D)
    f32 = f.astype(jnp.float32)

    # Fold batch into the matmul M dimension for the weight projection(s).
    f2 = f.reshape(tb * n, d)                        # (TB*N, D)  (leading-dim merge)

    # KF = F @ K^T : contract last axes of both operands (no transpose needed;
    # nn.Linear stores the weight as (out_features, in_features)).
    kf = lax.dot_general(
        f2, k_ref[...],
        dimension_numbers=(((1,), (1,)), ((), ())),
        preferred_element_type=jnp.float32,
    ).reshape(tb, n, d)                              # (TB, N, D)

    # S = F @ KF^T : batched, contracting the embedding axis.
    s = lax.dot_general(
        f32, kf,
        dimension_numbers=(((2,), (2,)), ((0,), (0,))),
        preferred_element_type=jnp.float32,
    )                                                # (TB, N, N)

    # (S.unsqueeze(-1) * einsum('bnd,bmd->bnmd')).sum(2)  ==  F * (S @ F)
    sf = lax.dot_general(
        s, f32,
        dimension_numbers=(((2,), (1,)), ((0,), (0,))),
        preferred_element_type=jnp.float32,
    )                                                # (TB, N, D)
    out = f32 * sf

    if q_ref is not None:                            # residual: F @ Q^T
        qf = lax.dot_general(
            f2, q_ref[...],
            dimension_numbers=(((1,), (1,)), ((), ())),
            preferred_element_type=jnp.float32,
        ).reshape(tb, n, d)
        out = out + qf

    o_ref[...] = out.astype(o_ref.dtype)


def _sam3e_kernel_residual(f_ref, k_ref, q_ref, o_ref):
    _sam3e_compute(f_ref, k_ref, q_ref, o_ref)


def _sam3e_kernel_plain(f_ref, k_ref, o_ref):
    _sam3e_compute(f_ref, k_ref, None, o_ref)


# ---------------------------------------------------------------------------
# Wrapper
# ---------------------------------------------------------------------------
def _pick_block_b(B, N, D, dtype, target_bytes=2 << 20):
    """Largest batch block whose F-tile stays under ~2 MiB while keeping >= 2
    grid steps (so both v7x TensorCores get work)."""
    itemsize = jnp.dtype(dtype).itemsize
    divisors = [t for t in range(1, B + 1) if B % t == 0]
    fitting = [t for t in divisors if t * N * D * itemsize <= target_bytes] or [1]
    multi = [t for t in fitting if B // t >= 2]
    return max(multi) if multi else max(fitting)


@functools.partial(jax.jit, static_argnames=("block_b",))
def sam3e_forward(F, K, Q=None, *, block_b=None):
    """SAM3E.forward.  F: (B, N, D); K, Q: (D, D) nn.Linear weights (out, in)."""
    B, N, D = F.shape
    if block_b is None:
        block_b = _pick_block_b(B, N, D, F.dtype)
    assert B % block_b == 0, (B, block_b)
    grid = (B // block_b,)

    f_spec = pl.BlockSpec((block_b, N, D), lambda b: (b, 0, 0))
    w_spec = pl.BlockSpec((D, D), lambda b: (0, 0))
    out_spec = pl.BlockSpec((block_b, N, D), lambda b: (b, 0, 0))

    use_residual = Q is not None
    kernel = _sam3e_kernel_residual if use_residual else _sam3e_kernel_plain
    in_specs = [f_spec, w_spec] + ([w_spec] if use_residual else [])
    args = (F, K, Q) if use_residual else (F, K)

    # Tiny per-step footprint here; for production N/D raise vmem_limit_bytes
    # and shrink block_b so the double-buffered tiles fit VMEM (64 MiB on v7x).
    return pl.pallas_call(
        kernel,
        out_shape=jax.ShapeDtypeStruct((B, N, D), F.dtype),
        grid_spec=pltpu.PrefetchScalarGridSpec(
            num_scalar_prefetch=0,
            grid=grid,
            in_specs=in_specs,
            out_specs=out_spec,
        ),
        compiler_params=pltpu.CompilerParams(
            dimension_semantics=("parallel",),
        ),
    )(*args)


# ---------------------------------------------------------------------------
# Pure-JAX reference (mirrors the PyTorch forward exactly)
# ---------------------------------------------------------------------------
def ref_sam3e(F, K, Q=None):
    KF = jnp.einsum("bnd,ed->bne", F, K)              # nn.Linear: x @ K^T
    S = jnp.einsum("bnd,bmd->bnm", F, KF)             # bmm(F, KF^T)
    U = jnp.einsum("bnd,bmd->bnmd", F, F)
    out = (S[..., None] * U).sum(axis=2)
    if Q is not None:
        out = out + jnp.einsum("bnd,ed->bne", F, Q)
    return out


# ---------------------------------------------------------------------------
if __name__ == "__main__":
    key = jax.random.PRNGKey(0)
    B, N, D = 16, 8, 32          # batch, num_fields, embedding_dim
    k_f, k_k, k_q = jax.random.split(key, 3)

    F = jax.random.normal(k_f, (B, N, D), dtype=jnp.float32)
    K = 0.1 * jax.random.normal(k_k, (D, D), dtype=jnp.float32)
    Q = 0.1 * jax.random.normal(k_q, (D, D), dtype=jnp.float32)

    # use_residual=True (default config)
    out_res = jax.block_until_ready(sam3e_forward(F, K, Q))
    ref_res = ref_sam3e(F, K, Q)
    assert out_res.shape == (B, N, D)
    assert jnp.allclose(out_res, ref_res, rtol=1e-4, atol=1e-4), "SAM3E(residual) mismatch"

    # use_residual=False (Q matmul compiled out, not multiplied by zeros)
    out_plain = jax.block_until_ready(sam3e_forward(F, K, None))
    ref_plain = ref_sam3e(F, K, None)
    assert jnp.allclose(out_plain, ref_plain, rtol=1e-4, atol=1e-4), "SAM3E(plain) mismatch"

    print("KERNEL_OK")
</pallas_src>

<mosaic_0001>
module attributes {stable_mosaic.version = 11 : i64} {
  func.func @_sam3e_kernel_residual(%arg0: i32, %arg1: memref<8x8x32xf32, #tpu.memory_space<vmem>>, %arg2: memref<32x32xf32, #tpu.memory_space<vmem>>, %arg3: memref<32x32xf32, #tpu.memory_space<vmem>>, %arg4: memref<8x8x32xf32, #tpu.memory_space<vmem>>) attributes {dimension_semantics = [#tpu.dimension_semantics<parallel>], iteration_bounds = array<i64: 2>, scalar_prefetch = 0 : i64, scratch_operands = 0 : i64, tpu.core_type = #tpu.core_type<tc>, window_params = [{transform_indices = @transform_0, window_bounds = array<i64: 8, 8, 32>}, {pipeline_mode = #tpu.pipeline_mode<synchronous>, transform_indices = @transform_1, window_bounds = array<i64: 32, 32>}, {pipeline_mode = #tpu.pipeline_mode<synchronous>, transform_indices = @transform_2, window_bounds = array<i64: 32, 32>}, {transform_indices = @transform_3, window_bounds = array<i64: 8, 8, 32>}]} {
    %c0 = arith.constant 0 : index
    %c0_0 = arith.constant 0 : index
    %c0_1 = arith.constant 0 : index
    %0 = vector.load %arg1[%c0, %c0_0, %c0_1] : memref<8x8x32xf32, #tpu.memory_space<vmem>>, vector<8x8x32xf32>
    %1 = vector.shape_cast %0 : vector<8x8x32xf32> to vector<64x32xf32>
    %c0_2 = arith.constant 0 : index
    %c0_3 = arith.constant 0 : index
    %2 = vector.load %arg2[%c0_2, %c0_3] : memref<32x32xf32, #tpu.memory_space<vmem>>, vector<32x32xf32>
    %cst = arith.constant dense<0.000000e+00> : vector<64x32xf32>
    %3 = tpu.matmul %1, %2, %cst {dimension_numbers = #tpu.dot_dimension_numbers<[1], [1], [0], [0], [0, 0, 1, 0], [], []>} : vector<64x32xf32>, vector<32x32xf32>, vector<64x32xf32> -> vector<64x32xf32>
    %4 = vector.shape_cast %3 : vector<64x32xf32> to vector<8x8x32xf32>
    %cst_4 = arith.constant dense<0.000000e+00> : vector<8x8x8xf32>
    %5 = tpu.matmul %0, %4, %cst_4 {dimension_numbers = #tpu.dot_dimension_numbers<[2], [2], [1], [1], [0, 0, 0, 1, 1, 1], [0], [0]>} : vector<8x8x32xf32>, vector<8x8x32xf32>, vector<8x8x8xf32> -> vector<8x8x8xf32>
    %cst_5 = arith.constant dense<0.000000e+00> : vector<8x8x32xf32>
    %6 = tpu.matmul %5, %0, %cst_5 {dimension_numbers = #tpu.dot_dimension_numbers<[2], [1], [1], [2], [0, 0, 0, 1, 1, 2], [0], [0]>} : vector<8x8x8xf32>, vector<8x8x32xf32>, vector<8x8x32xf32> -> vector<8x8x32xf32>
    %7 = arith.mulf %0, %6 : vector<8x8x32xf32>
    %c0_6 = arith.constant 0 : index
    %c0_7 = arith.constant 0 : index
    %8 = vector.load %arg3[%c0_6, %c0_7] : memref<32x32xf32, #tpu.memory_space<vmem>>, vector<32x32xf32>
    %cst_8 = arith.constant dense<0.000000e+00> : vector<64x32xf32>
    %9 = tpu.matmul %1, %8, %cst_8 {dimension_numbers = #tpu.dot_dimension_numbers<[1], [1], [0], [0], [0, 0, 1, 0], [], []>} : vector<64x32xf32>, vector<32x32xf32>, vector<64x32xf32> -> vector<64x32xf32>
    %10 = vector.shape_cast %9 : vector<64x32xf32> to vector<8x8x32xf32>
    %11 = arith.addf %7, %10 : vector<8x8x32xf32>
    %c0_9 = arith.constant 0 : index
    %c0_10 = arith.constant 0 : index
    %c0_11 = arith.constant 0 : index
    %12 = vector.load %arg4[%c0_9, %c0_10, %c0_11] : memref<8x8x32xf32, #tpu.memory_space<vmem>>, vector<8x8x32xf32>
    tpu.vector_store %arg4[%c0_9, %c0_10, %c0_11], %11 {strides = array<i32>} : memref<8x8x32xf32, #tpu.memory_space<vmem>>, vector<8x8x32xf32>,
    return
  }
  func.func @transform_0(%arg0: i32) -> (i32, i32, i32) {
    %c0_i32 = arith.constant 0 : i32
    %c0_i32_0 = arith.constant 0 : i32
    %c0_i32_1 = arith.constant 0 : i32
    return %arg0, %c0_i32, %c0_i32_0 : i32, i32, i32
  }
  func.func @transform_1(%arg0: i32) -> (i32, i32) {
    %c0_i32 = arith.constant 0 : i32
    %c0_i32_0 = arith.constant 0 : i32
    %c0_i32_1 = arith.constant 0 : i32
    return %c0_i32, %c0_i32_0 : i32, i32
  }
  func.func @transform_2(%arg0: i32) -> (i32, i32) {
    %c0_i32 = arith.constant 0 : i32
    %c0_i32_0 = arith.constant 0 : i32
    %c0_i32_1 = arith.constant 0 : i32
    return %c0_i32, %c0_i32_0 : i32, i32
  }
  func.func @transform_3(%arg0: i32) -> (i32, i32, i32) {
    %c0_i32 = arith.constant 0 : i32
    %c0_i32_0 = arith.constant 0 : i32
    %c0_i32_1 = arith.constant 0 : i32
    return %arg0, %c0_i32, %c0_i32_0 : i32, i32, i32
  }
}

</mosaic_0001>

<bundles_post_ra>
// kernel: sam3e_forward.1
= control target key start
LH: loop header
LB: loop body
LE: loop exit
PB: predicated region body
PF: predicated region fallthrough
CT: control target
= control target key end

     0   :  { %8 = vsyncpa [#allocation3], 0  ;;  %s1486_s0 = inlined_call_operand.hbm [shape: f32[16,8,32], index: 0, kind: input, shape index: {}]   ;;  %s1487_s1 = inlined_call_operand.hbm [shape: f32[32,32], index: 1, kind: input, shape index: {}]   ;;  %s1488_s2 = inlined_call_operand.hbm [shape: f32[32,32], index: 2, kind: input, shape index: {}]   ;;  %s1489_s3 = inlined_call_operand.hbm [shape: f32[16,8,32], index: 3, kind: output, shape index: {}]  }
   0x1   :  { %10 = vsyncpa [#allocation3 + $0x1], 0 }
   0x2   :  { %11 = vsyncpa [#allocation6], 0 }
   0x3   :  { %12 = vsyncpa [#allocation4], 0 }
   0x4   :  { %14 = vsyncpa [#allocation4 + $0x1], 0  ;;  %s1205_s12 = smov 0   ;;  %s1207_s13 = smov 0  }
   0x5   :  { %s1209_s14 = smov 0   ;;  %s1211_s15 = smov 0  }
   0x6 LB: > { %s1226_s16 = sadd.s32 4294967295, %s1177_s15   ;;  %s874_s17 = sadd.s32 4294967294, %s1177_s15   ;;  %s1177_s15 = sphi %s1211_s15, %s1499_s15   ;;  %s1173_s14 = sphi %s1209_s14, %s1498_s14   ;;  %s1169_s13 = sphi %s1207_s13, %s1497_s13   ;;  %s1165_s12 = sphi %s1205_s12, %s1496_s12  }
   0x7   : > { %p40_p0 = scmp.ne.s32.totalorder %s1169_s13, %s1165_s12  ;;  %p41_p1 = scmp.eq.s32.totalorder %s1226_s16, 0 }
   0x8   : > { %p106_p2 = scmp.eq.s32.totalorder %s1226_s16, 1  ;;  %p112_p3 = scmp.eq.s32.totalorder %s874_s17, 1 }
   0x9   : > { %p1235_p4 = por %p41_p1, %p40_p0  ;;  %p875_p5 = scmp.ge.s32.totalorder %s1177_s15, 1 }
   0xa   : > { %p1240_p6 = por %p112_p3, %p40_p0  ;;  %p119_p7 = scmp.lt.s32.totalorder %s1177_s15, 3 }
   0xb   : > { %s130_s22 = sshll.u32 %s1487_s1, 4  ;;  %s1179_s24 = smov [#allocation5]   ;;  %s131_s22 = int_to_ptr.hbm [resolvable:$true] %s130_s22 }
   0xc   : > { %p1248_p8 = pnand %p875_p5, %p119_p7  ;;  %s132_s25 = sshll.u32 %s1179_s24, 4  ;;  %s133_s25 = int_to_ptr.vmem [resolvable:$true] %s132_s25 }
   0xd   : > { %s144_s28 = sshll.u32 %s1488_s2, 4  ;;  %s1180_s29 = smov 128   ;;  %s145_s28 = int_to_ptr.hbm [resolvable:$true] %s144_s28 }
   0xe   : > { %p958_p9 = pneg %p1248_p8  ;;  %s1181_s30 = smov 8  }
   0xf   : > { %s1182_s4 = smov [#allocation7]   ;;  %s1267_s6 = sadd.s32 1, %s1177_s15  }
  0x10   : > { %p959_p10 = pnand %p958_p9, %p41_p1  ;;  %s146_s5 = sshll.u32 %s1182_s4, 4  ;;  %s147_s5 = int_to_ptr.vmem [resolvable:$true] %s146_s5 }
  0x11   : > { %s27_s7 = sadd.s32 1, %s1173_s14  ;;  %s24_s8 = ssub.s32 %s1177_s15, %s1267_s6 }
  0x12   : > { %961 = dma.hbm_to_vmem [thread:$0]  (!%p959_p10), %s131_s22, 512, %s133_s25, [#allocation6], %s1180_s29, %s1180_s29, %s1181_s30  }
  0x13   : > { %964 = dma.hbm_to_vmem [thread:$0]  (!%p959_p10), %s145_s28, 512, %s147_s5, [#allocation6], %s1180_s29, %s1180_s29, %s1181_s30  }
  0x14   : > { %p34_p12 = scmp.ne.s32.totalorder %s1173_s14, %s1169_s13  ;;  %p25_p13 = scmp.eq.s32.totalorder %s24_s8, 0 }
  0x15   : > { %p35_p0 = scmp.eq.s32.totalorder %s1177_s15, 0  ;;  %p975_p5 = scmp.lt.s32.totalorder %s1177_s15, 2 }
  0x16   : > { %p1277_p3 = por %p106_p2, %p34_p12  ;;  %s160_s11 = sand.u32 1, %s1173_s14  }
  0x17   : > { %s1283_s10 = scalar_select %p25_p13, %s1173_s14, %s27_s7  }
  0x18   : > { %p36_p7 = por %p35_p0, %p34_p12  ;;  %s879_s17 = sshll.u32 %s160_s11, 6 }
  0x19   : > { %s940_s20 = sshll.u32 %s1177_s15, 6  ;;  %s164_s25 = scalar_lea.vmem [#allocation2], %s879_s17 }
  0x1a   : > { %s169_s24 = scalar_lea.hbm %s1486_s0, %s940_s20  ;;  %s172_s26 = sshll.u32 %s164_s25, 4  ;;  %s173_s26 = int_to_ptr.vmem [resolvable:$true] %s172_s26 }
  0x1b   : > { %s170_s27 = sshll.u32 %s169_s24, 4  ;;  %p1290_p2 = pnand %p975_p5, %p36_p7  ;;  %s171_s27 = int_to_ptr.hbm [resolvable:$true] %s170_s27 }
  0x1c   : > { %s161_s4 = scalar_lea.sflag [#allocation3], %s160_s11  ;;  %s1077_s5 = sshra.s32 %s171_s27, 4  ;;  %s1078_s5 = int_to_ptr.hbm [resolvable:$true] %s1077_s5 }
  0x1d   : > { %s1079_s7 = scalar_lea.hbm %s1078_s5, 64  ;;  %p1081_p10 = pneg %p1290_p2 }
  0x1e   : > { %p1080_p9 = scmp.ne.s32.totalorder %s1078_s5, %s1079_s7  ;;  %s1084_s20 = scalar_lea.hbm %s1486_s0, 128 }
  0x1f   : > { %p1085_p0 = scmp.lt.s32.totalorder %s1078_s5, %s1486_s0  ;;  %p1086_p5 = scmp.lt.s32.totalorder %s1084_s20, %s1079_s7 }
  0x20   : > { %p1082_p12 = pnand %p1081_p10, %p1080_p9 }
  0x21   : > { %p1087_p7 = por %p1086_p5, %p1085_p0 }
  0x22   : > { %p1083_p13 = pneg %p1082_p12 }
  0x24   : > { %p1088_p11 = pnand %p1087_p7, %p1083_p13 }
  0x26   : > { %1091 = shalt.err (!%p1088_p11)
}
  0x27   : > { %968 = dma.hbm_to_vmem [thread:$0]  (!%p1290_p2), %s171_s27, 1024, %s173_s26, %s161_s4, %s1180_s29, %s1180_s29, %s1181_s30  }
  0x28   : > { %184 = sbr.rel (%p1248_p8) target bundleno = 545 (0x221), region = 32  ;;  %s1310_s11 = sand.u32 (!%p1248_p8), 1, %s1169_s13  }
  0x29   : > { %s883_s24 = sshll.u32 (!%p1248_p8), %s1310_s11, 6  ;;  %s187_s25 = scalar_lea.sflag (!%p1248_p8), [#allocation3], %s1310_s11 }
  0x2a   : > { %s190_s5 = scalar_lea.vmem (!%p1248_p8), [#allocation2], %s883_s24 }
  0x2d   : > { %1152 = dma.done.wait (%p1235_p4), %s187_s25, 1024  }
  0x2e   : > { %1154 = vsyncadd (%p1235_p4), %s187_s25, 4294966272 }
  0x2f   : > { %1156 = dma.done.wait (%p41_p1), [#allocation6], 1024  }
  0x30   : > { %1158 = vsyncadd (%p41_p1), [#allocation6], 4294966272  ;;  %vm238_vm0 = vcmask 261120   ;;  %v237_v0 = vld [vmem:[#allocation5 + $0x18] sm:$0xff]  ;;  %v1325_v1 = vld [vmem:[%s190_s5] sm:$0xff]  ;;  %vm500_vm1 = vcmask 64512  }
  0x31   : > { %887 = vmatpush.xpose.msk.msra.mxu0 %vm238_vm0, %v237_v0  ;;  %v236_v2 = vld [vmem:[#allocation5 + $0x10] sm:$0xff]  ;;  %v1327_v3 = vld [vmem:[%s190_s5 + $0x18] sm:$0xff]  ;;  %519 = vmatpush.msra.mxu3 %v1325_v1  ;;  %v235_v4 = vld [vmem:[#allocation5 + $0x8] sm:$0xff]  ;;  %s1427_s18 = scalar_lea.vmem [#allocation8], %s883_s24  ;;  %s941_s23 = sshll.u32 %s1226_s16, 6 }
  0x32   : > { %v234_v5 = vld [vmem:[#allocation5] sm:$0xff]  ;;  %v1336_v6 = vld [vmem:[%s190_s5 + $0x8] sm:$0xff]  ;;  %v1340_v7 = vld [vmem:[%s190_s5 + $0x10] sm:$0xff]  ;;  %s778_s26 = scalar_lea.hbm %s1489_s3, %s941_s23  ;;  %s779_s27 = sshll.u32 %s1427_s18, 4  ;;  %s780_s27 = int_to_ptr.vmem [resolvable:$true] %s779_s27 }
  0x33   : > { %588 = vmatpush.msrb.mxu3 %v1327_v3  ;;  %v1346_v8 = vld [vmem:[%s190_s5 + $0x20] sm:$0xff]  ;;  %v1350_v9 = vld [vmem:[%s190_s5 + $0x28] sm:$0xff]  ;;  %v1354_v10 = vld [vmem:[%s190_s5 + $0x30] sm:$0xff]  ;;  %s781_s28 = sshll.u32 %s778_s26, 4  ;;  %s767_s16 = scalar_lea.sflag [#allocation4], %s1310_s11  ;;  %s782_s28 = int_to_ptr.hbm [resolvable:$true] %s781_s28 }
  0x34   : > { %v1358_v11 = vld [vmem:[%s190_s5 + $0x38] sm:$0xff]  ;;  %v695_v23 = vld [vmem:[#allocation7 + $0x10] sm:$0xff]  ;;  %v694_v24 = vld [vmem:[#allocation7 + $0x8] sm:$0xff]  ;;  %s1121_s4 = sshra.s32 %s782_s28, 4  ;;  %s1127_s20 = scalar_lea.hbm %s1489_s3, 128  ;;  %s1122_s4 = int_to_ptr.hbm [resolvable:$true] %s1121_s4 }
  0x35   : > { %888 = vmatpush.xpose.msk.msra.mxu0 %vm238_vm0, %v236_v2  ;;  %v696_v21 = vld [vmem:[#allocation7 + $0x18] sm:$0xff]  ;;  %v693_v27 = vld [vmem:[#allocation7] sm:$0xff]  ;;  %s1123_s7 = scalar_lea.hbm %s1122_s4, 64  ;;  %p1128_p11 = scmp.lt.s32.totalorder %s1122_s4, %s1489_s3 }
  0x36   : > { %p1124_p1 = scmp.ne.s32.totalorder %s1122_s4, %s1123_s7  ;;  %p1129_p2 = scmp.lt.s32.totalorder %s1127_s20, %s1123_s7 }
  0x38   : > { %p1125_p4 = pnand %p1124_p1, %p1277_p3  ;;  %p1130_p9 = por %p1129_p2, %p1128_p11 }
  0x39   : > { %889 = vmatpush.xpose.msk.msra.mxu0 %vm238_vm0, %v235_v4 }
  0x3a   : > { %p1126_p8 = pneg %p1125_p4 }
  0x3c   : > { %p1131_p10 = pnand %p1130_p9, %p1126_p8 }
  0x3d   : > { %890 = vmatpush.xpose.msk.msra.mxu0 %vm238_vm0, %v234_v5 }
  0x40   : > { %891 = vmatmul.msk.f32.vlgmr.msra.gmra.mxu0 %vm238_vm0, %v1325_v1 }
  0x48   : > { %892 = vmatmul.msk.f32.gmra.mxu0 %vm238_vm0, %v1336_v6 }
  0x50   : > { %893 = vmatmul.msk.f32.gmra.mxu0 %vm238_vm0, %v1340_v7 }
  0x58   : > { %894 = vmatmul.msk.f32.gmra.mxu0 %vm238_vm0, %v1327_v3 }
  0x60   : > { %895 = vmatmul.msk.f32.gmra.mxu0 %vm238_vm0, %v1346_v8 }
  0x68   : > { %896 = vmatmul.msk.f32.gmra.mxu0 %vm238_vm0, %v1350_v9 }
  0x70   : > { %897 = vmatmul.msk.f32.gmra.mxu0 %vm238_vm0, %v1354_v10 }
  0x78   : > { %898 = vmatmul.msk.f32.gmra.mxu0 %vm238_vm0, %v1358_v11 }
  0xbd   : > { %v292_v12 = vpop.f32.mrf.mxu0 }
  0xbe   : > { %899 = vmatpush.xpose.msk.msra.mxu1 %vm238_vm0, %v292_v12 }
  0xc1   : > { %900 = vmatmul.msk.f32.vlgmr.msra.gmra.mxu1 %vm238_vm0, %v1325_v1 }
  0xc5   : > { %v295_v13 = vpop.f32.mrf.mxu0 }
  0xc6   : > { %901 = vmatpush.xpose.msk.msra.mxu2 %vm238_vm0, %v295_v13 }
  0xc9   : > { %902 = vmatmul.msk.f32.vlgmr.msra.gmra.mxu2 %vm238_vm0, %v1336_v6 }
  0xcd   : > { %v298_v14 = vpop.f32.mrf.mxu0 }
  0xce   : > { %903 = vmatpush.xpose.msk.msrb.mxu1 %vm238_vm0, %v298_v14 }
  0xd1   : > { %904 = vmatmul.msk.f32.vlgmr.msrb.gmra.mxu1 %vm238_vm0, %v1340_v7 }
  0xd5   : > { %v301_v15 = vpop.f32.mrf.mxu0 }
  0xd6   : > { %905 = vmatpush.xpose.msk.msra.mxu1 %vm238_vm0, %v301_v15 }
  0xd9   : > { %906 = vmatmul.msk.f32.vlgmr.msra.gmra.mxu1 %vm238_vm0, %v1327_v3 }
  0xdd   : > { %v304_v16 = vpop.f32.mrf.mxu0 }
  0xde   : > { %907 = vmatpush.xpose.msk.msrb.mxu2 %vm238_vm0, %v304_v16 }
  0xe1   : > { %908 = vmatmul.msk.f32.vlgmr.msrb.gmra.mxu2 %vm238_vm0, %v1346_v8 }
  0xe5   : > { %v307_v17 = vpop.f32.mrf.mxu0 }
  0xe6   : > { %909 = vmatpush.xpose.msk.msrb.mxu1 %vm238_vm0, %v307_v17 }
  0xe9   : > { %910 = vmatmul.msk.f32.vlgmr.msrb.gmra.mxu1 %vm238_vm0, %v1350_v9 }
  0xed   : > { %v310_v18 = vpop.f32.mrf.mxu0 }
  0xee   : > { %911 = vmatpush.xpose.msk.msra.mxu1 %vm238_vm0, %v310_v18 }
  0xf1   : > { %912 = vmatmul.msk.f32.vlgmr.msra.gmra.mxu1 %vm238_vm0, %v1354_v10 }
  0xf2   : > { %542 = vmatpush.msrb.mxu1 %v1336_v6 }
  0xf4   : > { %611 = vmatpush.msra.mxu1 %v1346_v8 }
  0xf5   : > { %v313_v19 = vpop.f32.mrf.mxu0 }
  0xf6   : > { %913 = vmatpush.xpose.msk.msra.mxu2 %vm238_vm0, %v313_v19 }
  0xf9   : > { %914 = vmatmul.msk.f32.vlgmr.msra.gmra.mxu2 %vm238_vm0, %v1358_v11 }
  0xfa   : > { %565 = vmatpush.msrb.mxu2 %v1340_v7 }
  0xfc   : > { %634 = vmatpush.msra.mxu2 %v1350_v9 }
 0x13e   : > { %v336_v20 = vpop.f32.mrf.mxu1 }
 0x13f   : > { %915 = vmatmul.msk.f32.vlgmr.msra.gmra.mxu3 %vm500_vm1, %v336_v20 }
 0x140   : > { %657 = vmatpush.msra.mxu3 %v1354_v10 }
 0x14c   : > { %v359_v26 = vpop.f32.mrf.mxu2 }
 0x14d   : > { %916 = vmatmul.msk.f32.vlgmr.msrb.gmra.mxu1 %vm500_vm1, %v359_v26 }
 0x14e   : > { %v382_v22 = vpop.f32.mrf.mxu1  ;;  %680 = vmatpush.msrb.mxu1 %v1358_v11 }
 0x14f   : > { %917 = vmatmul.msk.f32.vlgmr.msrb.gmra.mxu2 %vm500_vm1, %v382_v22 }
 0x150   : > { %923 = vmatpush.xpose.msk.msrb.mxu2 %vm238_vm0, %v696_v21 }
 0x154   : > { %924 = vmatpush.xpose.msk.msrb.mxu2 %vm238_vm0, %v695_v23 }
 0x156   : > { %v405_v25 = vpop.f32.mrf.mxu1 }
 0x157   : > { %918 = vmatmul.msk.f32.vlgmr.msrb.gmra.mxu3 %vm500_vm1, %v405_v25 }
 0x158   : > { %942 = vmatpush.xpose.msk.msrb.mxu3 %vm238_vm0, %v696_v21  ;;  %925 = vmatpush.xpose.msk.msrb.mxu2 %vm238_vm0, %v694_v24 }
 0x15c   : > { %943 = vmatpush.xpose.msk.msrb.mxu3 %vm238_vm0, %v695_v23  ;;  %926 = vmatpush.xpose.msk.msrb.mxu2 %vm238_vm0, %v693_v27 }
 0x160   : > { %944 = vmatpush.xpose.msk.msrb.mxu3 %vm238_vm0, %v694_v24 }
 0x164   : > { %945 = vmatpush.xpose.msk.msrb.mxu3 %vm238_vm0, %v693_v27  ;;  %v428_v28 = vpop.f32.mrf.mxu2 }
 0x165   : > { %919 = vmatmul.msk.f32.vlgmr.msra.gmra.mxu1 %vm500_vm1, %v428_v28 }
 0x166   : > { %v451_v29 = vpop.f32.mrf.mxu1 }
 0x167   : > { %920 = vmatmul.msk.f32.vlgmr.msra.gmra.mxu2 %vm500_vm1, %v451_v29 }
 0x16e   : > { %v474_v30 = vpop.f32.mrf.mxu1 }
 0x16f   : > { %921 = vmatmul.msk.f32.vlgmr.msra.gmra.mxu3 %vm500_vm1, %v474_v30  ;;  %927 = vmatmul.msk.f32.vlgmr.msrb.gmra.mxu2 %vm238_vm0, %v1325_v1 }
 0x177   : > { %928 = vmatmul.msk.f32.gmra.mxu2 %vm238_vm0, %v1336_v6  ;;  %930 = vmatmul.msk.f32.vlgmr.msrb.gmra.mxu3 %vm238_vm0, %v1327_v3 }
 0x17c   : > { %v497_v31 = vpop.f32.mrf.mxu2 }
 0x17d   : > { %922 = vmatmul.msk.f32.vlgmr.msrb.gmra.mxu1 %vm500_vm1, %v497_v31 }
 0x17f   : > { %929 = vmatmul.msk.f32.gmra.mxu2 %vm238_vm0, %v1340_v7  ;;  %931 = vmatmul.msk.f32.gmra.mxu3 %vm238_vm0, %v1346_v8 }
 0x187   : > { %932 = vmatmul.msk.f32.gmra.mxu3 %vm238_vm0, %v1350_v9 }
 0x18f   : > { %933 = vmatmul.msk.f32.gmra.mxu3 %vm238_vm0, %v1354_v10 }
 0x197   : > { %934 = vmatmul.msk.f32.gmra.mxu3 %vm238_vm0, %v1358_v11 }
 0x1c2   : > { %v521_v32 = vpop.f32.mrf.mxu3 }
 0x1c3   : > { %v685_v36 = vmul.f32 %v521_v32, %v1325_v1 }
 0x1ca   : > { %v544_v37 = vpop.f32.mrf.mxu1 }
 0x1cb   : > { %v686_v41 = vmul.f32 %v544_v37, %v1336_v6 }
 0x1d2   : > { %v567_v33 = vpop.f32.mrf.mxu2 }
 0x1d3   : > { %v687_v49 = vmul.f32 %v567_v33, %v1340_v7 }
 0x1da   : > { %v590_v34 = vpop.f32.mrf.mxu3 }
 0x1db   : > { %v688_v42 = vmul.f32 %v590_v34, %v1327_v3 }
 0x1e2   : > { %v613_v47 = vpop.f32.mrf.mxu1 }
 0x1e3   : > { %v689_v48 = vmul.f32 %v613_v47, %v1346_v8 }
 0x1ea   : > { %v636_v35 = vpop.f32.mrf.mxu2 }
 0x1eb   : > { %v690_v54 = vmul.f32 %v636_v35, %v1350_v9 }
 0x1f2   : > { %v659_v38 = vpop.f32.mrf.mxu3  ;;  %v726_v39 = vpop.f32.mrf.mxu2 }
 0x1f3   : > { %v750_v40 = vadd.f32 %v726_v39, %v685_v36  ;;  %v691_v57 = vmul.f32 %v659_v38, %v1354_v10 }
 0x1f5   : > { %758 = vst.msk [vmem:[%s1427_s18] sm:$0xff] %vm238_vm0, %v750_v40 }
 0x1fa   : > { %v729_v43 = vpop.f32.mrf.mxu2  ;;  %v735_v44 = vpop.f32.mrf.mxu3 }
 0x1fb   : > { %v753_v45 = vadd.f32 %v735_v44, %v688_v42  ;;  %v751_v46 = vadd.f32 %v729_v43, %v686_v41  ;;  %v682_v60 = vpop.f32.mrf.mxu1 }
 0x1fc   : > { %v692_v61 = vmul.f32 %v682_v60, %v1358_v11 }
 0x1fd   : > { %761 = vst.msk [vmem:[%s1427_s18 + $0x18] sm:$0xff] %vm238_vm0, %v753_v45 }
 0x1fe   : > { %759 = vst.msk [vmem:[%s1427_s18 + $0x8] sm:$0xff] %vm238_vm0, %v751_v46 }
 0x202   : > { %v732_v50 = vpop.f32.mrf.mxu2  ;;  %v738_v51 = vpop.f32.mrf.mxu3 }
 0x203   : > { %v752_v52 = vadd.f32 %v732_v50, %v687_v49  ;;  %v754_v53 = vadd.f32 %v738_v51, %v689_v48 }
 0x205   : > { %760 = vst.msk [vmem:[%s1427_s18 + $0x10] sm:$0xff] %vm238_vm0, %v752_v52 }
 0x206   : > { %762 = vst.msk [vmem:[%s1427_s18 + $0x20] sm:$0xff] %vm238_vm0, %v754_v53 }
 0x20a   : > { %v741_v55 = vpop.f32.mrf.mxu3 }
 0x20b   : > { %v755_v56 = vadd.f32 %v741_v55, %v690_v54 }
 0x20d   : > { %763 = vst.msk [vmem:[%s1427_s18 + $0x28] sm:$0xff] %vm238_vm0, %v755_v56 }
 0x212   : > { %v744_v58 = vpop.f32.mrf.mxu3 }
 0x213   : > { %v756_v59 = vadd.f32 %v744_v58, %v691_v57 }
 0x215   : > { %764 = vst.msk [vmem:[%s1427_s18 + $0x30] sm:$0xff] %vm238_vm0, %v756_v59 }
 0x21a   : > { %v747_v62 = vpop.f32.mrf.mxu3 }
 0x21b   : > { %v757_v63 = vadd.f32 %v747_v62, %v692_v61 }
 0x21d   : > { %765 = vst.msk [vmem:[%s1427_s18 + $0x38] sm:$0xff] %vm238_vm0, %v757_v63 }
 0x21e   : > { %1134 = shalt.err (!%p1131_p10)
}
 0x21f   : > { %s1183_s11 = smov 128   ;;  %s1184_s24 = smov 8  }
 0x220   : > { %956 = dma.vmem_to_hbm [thread:$0]  (%p1277_p3), %s780_s27, 1024, %s782_s28, %s767_s16, %s1183_s11, %s1183_s11, %s1184_s24  }
 0x221 PF: > { %s796_s25 = sand.u32 1, %s1165_s12   ;;  %p1495_p12 = scmp.ge.s32.totalorder %s1177_s15, 2 }
 0x222   : > { %s797_s5 = scalar_lea.sflag [#allocation4], %s796_s25 }
 0x223   : > { %p970_p13 = pnand %p1495_p12, %p1240_p6 }
 0x225   : > { %p971_p0 = pneg %p970_p13 }
 0x227   : > { %1160 = dma.done.wait (%p971_p0), %s797_s5, 1024  }
 0x228   : > { %1162 = vsyncadd (%p971_p0), %s797_s5, 4294966272  ;;  %p17_p5 = scmp.ge.s32.totalorder %s1267_s6, 4   ;;  %s1496_s12 = smov %s1169_s13 }
 0x229   : > { %s1497_s13 = smov %s1173_s14  ;;  %s1498_s14 = smov %s1283_s10 }
 0x22a   : > { %s1499_s15 = smov %s1267_s6  ;;  %19 = sbr.rel (!%p17_p5) target bundleno = 6 (0x6), region = 85 }
 0x22f   :  { %803 = vsyncpa [#allocation3], 1 }
 0x230   :  { %805 = vsyncpa [#allocation3 + $0x1], 1 }
 0x231   :  { %806 = vsyncpa [#allocation6], 1 }
 0x232   :  { %807 = vsyncpa [#allocation4], 1 }
 0x233   :  { %809 = vsyncpa [#allocation4 + $0x1], 1 }

</bundles_post_ra>
